<compile_context>
chip_gen: v7x
topology: tpu7x:2x2x1
jax: 0.10.0
libtpu: 0.0.40
codegen_flags: <defaults>
</compile_context>

<pallas_src>
import functools

import jax
import jax.numpy as jnp
from jax.experimental import pallas as pl
from jax.experimental.pallas import tpu as pltpu

NEG_SLOPE = 0.01  # nn.LeakyReLU default
LANE = 128
HIDDEN = 128


def _leaky_relu(x):
    return jnp.where(x > 0, x, NEG_SLOPE * x)


def _round_up(n, m):
    return ((n + m - 1) // m) * m


def autoencoder_kernel(
    x_ref,                       # (bt, in_pad)  bf16
    w1_ref, b1_ref,              # (in_pad, 128) bf16, (1, 128) f32
    w2_ref, b2_ref,              # (128, lat_pad) bf16, (1, lat_pad) f32
    w3_ref, b3_ref,              # (lat_pad, 128) bf16, (1, 128) f32
    w4_ref, b4_ref,              # (128, in_pad) bf16, (1, in_pad) f32
    latent_ref, recon_ref,       # (bt, lat_pad) f32, (bt, in_pad) f32
):
    x = x_ref[...]

    # biases read once per tile (f32 rows, broadcast over batch by the add)
    b1 = b1_ref[...]
    b2 = b2_ref[...]
    b3 = b3_ref[...]
    b4 = b4_ref[...]

    # --- encoder --- (bf16 MXU inputs, f32 accumulate, f32 activations)
    h1 = jnp.dot(x, w1_ref[...], preferred_element_type=jnp.float32) + b1
    h1 = _leaky_relu(h1).astype(jnp.bfloat16)
    z = jnp.dot(h1, w2_ref[...], preferred_element_type=jnp.float32) + b2
    z = _leaky_relu(z)

    # --- decoder ---
    h2 = jnp.dot(z.astype(jnp.bfloat16), w3_ref[...],
                 preferred_element_type=jnp.float32) + b3
    h2 = _leaky_relu(h2).astype(jnp.bfloat16)
    r = jnp.dot(h2, w4_ref[...], preferred_element_type=jnp.float32) + b4
    # sigmoid = 1 / (1 + exp(-r)): exp on EUP, reciprocal on EUP (approx) -> VALU stays free
    r = pl.reciprocal(1.0 + jnp.exp(-r), approx=True)

    latent_ref[...] = z.astype(latent_ref.dtype)
    recon_ref[...] = r.astype(recon_ref.dtype)


@functools.partial(jax.jit, static_argnames=("batch_tile",))
def autoencoder_forward(x, params, batch_tile=256):
    """x: (B, input_dim) float32. params: dict of f32 weights/biases.

    Returns (latent (B, latent_dim), reconstructed (B, input_dim)), both f32.
    """
    B, input_dim = x.shape
    w1, b1 = params["w1"], params["b1"]
    w2, b2 = params["w2"], params["b2"]
    w3, b3 = params["w3"], params["b3"]
    w4, b4 = params["w4"], params["b4"]
    latent_dim = w2.shape[1]

    # ---- lane-dense padding of feature dims + ragged-batch padding ----
    in_pad = _round_up(input_dim, LANE)
    lat_pad = _round_up(latent_dim, LANE)
    bt = max(8, batch_tile)
    B_pad = _round_up(B, bt)

    bf16 = jnp.bfloat16
    x_p = jnp.pad(x, ((0, B_pad - B), (0, in_pad - input_dim))).astype(bf16)
    w1_p = jnp.pad(w1, ((0, in_pad - input_dim), (0, 0))).astype(bf16)
    b1_p = b1.reshape(1, HIDDEN).astype(jnp.float32)
    w2_p = jnp.pad(w2, ((0, 0), (0, lat_pad - latent_dim))).astype(bf16)
    b2_p = jnp.pad(b2.reshape(1, latent_dim),
                   ((0, 0), (0, lat_pad - latent_dim))).astype(jnp.float32)
    w3_p = jnp.pad(w3, ((0, lat_pad - latent_dim), (0, 0))).astype(bf16)
    b3_p = b3.reshape(1, HIDDEN).astype(jnp.float32)
    w4_p = jnp.pad(w4, ((0, 0), (0, in_pad - input_dim))).astype(bf16)
    b4_p = jnp.pad(b4.reshape(1, input_dim),
                   ((0, 0), (0, in_pad - input_dim))).astype(jnp.float32)

    grid = (B_pad // bt,)

    # Weights/biases: full-array blocks replicated across the batch grid.
    # TODO(synk): for very large input_dim (>= ~4K) on v7x (64 MiB VMEM), tile
    # w1 along K / w4 along N with a reduction grid axis instead of whole-array
    # replication.
    def whole(shape):
        return pl.BlockSpec(shape, lambda i: tuple(0 for _ in shape))

    in_specs = [
        pl.BlockSpec((bt, in_pad), lambda i: (i, 0)),
        whole(w1_p.shape), whole(b1_p.shape),
        whole(w2_p.shape), whole(b2_p.shape),
        whole(w3_p.shape), whole(b3_p.shape),
        whole(w4_p.shape), whole(b4_p.shape),
    ]
    out_specs = [
        pl.BlockSpec((bt, lat_pad), lambda i: (i, 0)),
        pl.BlockSpec((bt, in_pad), lambda i: (i, 0)),
    ]
    out_shape = [
        jax.ShapeDtypeStruct((B_pad, lat_pad), jnp.float32),
        jax.ShapeDtypeStruct((B_pad, in_pad), jnp.float32),
    ]

    flops = 2 * B_pad * (in_pad * HIDDEN + HIDDEN * lat_pad
                         + lat_pad * HIDDEN + HIDDEN * in_pad)
    bytes_accessed = (
        x_p.size * 2
        + (w1_p.size + w2_p.size + w3_p.size + w4_p.size) * 2
        + (b1_p.size + b2_p.size + b3_p.size + b4_p.size) * 4
        + (B_pad * lat_pad + B_pad * in_pad) * 4
    )

    latent_p, recon_p = pl.pallas_call(
        autoencoder_kernel,
        grid=grid,
        in_specs=in_specs,
        out_specs=out_specs,
        out_shape=out_shape,
        compiler_params=pltpu.CompilerParams(
            dimension_semantics=("parallel",),
        ),
        cost_estimate=pl.CostEstimate(
            flops=flops,
            transcendentals=B_pad * in_pad,
            bytes_accessed=bytes_accessed,
        ),
    )(x_p, w1_p, b1_p, w2_p, b2_p, w3_p, b3_p, w4_p, b4_p)

    # strip padding
    return latent_p[:B, :latent_dim], recon_p[:B, :input_dim]


def init_params(key, input_dim, latent_dim, hidden=HIDDEN):
    """Deterministic synthetic init (uniform, roughly PyTorch fan_in scaling)."""
    ks = jax.random.split(key, 8)

    def lin(kw, kb, fan_in, fan_out):
        bound = 1.0 / jnp.sqrt(fan_in)
        w = jax.random.uniform(kw, (fan_in, fan_out), jnp.float32, -bound, bound)
        b = jax.random.uniform(kb, (1, fan_out), jnp.float32, -bound, bound)
        return w, b

    w1, b1 = lin(ks[0], ks[1], input_dim, hidden)
    w2, b2 = lin(ks[2], ks[3], hidden, latent_dim)
    w3, b3 = lin(ks[4], ks[5], latent_dim, hidden)
    w4, b4 = lin(ks[6], ks[7], hidden, input_dim)
    return dict(w1=w1, b1=b1, w2=w2, b2=b2, w3=w3, b3=b3, w4=w4, b4=b4)


def reference_forward(x, p):
    """Plain-JAX reference mimicking the kernel's bf16-in / f32-accumulate path."""
    bf16 = jnp.bfloat16

    def lin(a, w, b):
        return jnp.dot(a.astype(bf16), w.astype(bf16),
                       preferred_element_type=jnp.float32) + b.reshape(1, -1)

    def lrelu(v):
        return jnp.where(v > 0, v, NEG_SLOPE * v)

    h = lrelu(lin(x, p["w1"], p["b1"]))
    z = lrelu(lin(h, p["w2"], p["b2"]))
    h2 = lrelu(lin(z, p["w3"], p["b3"]))
    r = jax.nn.sigmoid(lin(h2, p["w4"], p["b4"]))
    return z, r


if __name__ == "__main__":
    key = jax.random.PRNGKey(0)
    k_in, k_param = jax.random.split(key)

    # Small-but-MXU-friendly demo shapes: batch 256 with a 128-row tile gives a
    # 2-step parallel grid (both v7x TCs busy); feature dims are padded to 128
    # lanes inside the wrapper.
    batch, input_dim, latent_dim = 256, 64, 32
    x = jax.random.uniform(k_in, (batch, input_dim), jnp.float32)
    params = init_params(k_param, input_dim, latent_dim)

    latent, recon = autoencoder_forward(x, params, batch_tile=128)
    jax.block_until_ready((latent, recon))

    # sanity check against a plain-JAX reference (same bf16 matmul precision)
    ref_latent, ref_recon = reference_forward(x, params)
    assert latent.shape == (batch, latent_dim)
    assert recon.shape == (batch, input_dim)
    assert jnp.allclose(latent, ref_latent, atol=2e-3, rtol=2e-3)
    assert jnp.allclose(recon, ref_recon, atol=2e-3, rtol=2e-3)

    print("KERNEL_OK")
</pallas_src>

<mosaic_0001>
module attributes {stable_mosaic.version = 11 : i64} {
  func.func @autoencoder_kernel(%arg0: i32, %arg1: memref<128x128xbf16, #tpu.memory_space<vmem>>, %arg2: memref<128x128xbf16, #tpu.memory_space<vmem>>, %arg3: memref<1x128xf32, #tpu.memory_space<vmem>>, %arg4: memref<128x128xbf16, #tpu.memory_space<vmem>>, %arg5: memref<1x128xf32, #tpu.memory_space<vmem>>, %arg6: memref<128x128xbf16, #tpu.memory_space<vmem>>, %arg7: memref<1x128xf32, #tpu.memory_space<vmem>>, %arg8: memref<128x128xbf16, #tpu.memory_space<vmem>>, %arg9: memref<1x128xf32, #tpu.memory_space<vmem>>, %arg10: memref<128x128xf32, #tpu.memory_space<vmem>>, %arg11: memref<128x128xf32, #tpu.memory_space<vmem>>) attributes {dimension_semantics = [#tpu.dimension_semantics<parallel>], iteration_bounds = array<i64: 2>, scalar_prefetch = 0 : i64, scratch_operands = 0 : i64, tpu.core_type = #tpu.core_type<tc>, window_params = [{transform_indices = @transform_0, window_bounds = array<i64: 128, 128>}, {pipeline_mode = #tpu.pipeline_mode<synchronous>, transform_indices = @transform_1, window_bounds = array<i64: 128, 128>}, {pipeline_mode = #tpu.pipeline_mode<synchronous>, transform_indices = @transform_2, window_bounds = array<i64: 1, 128>}, {pipeline_mode = #tpu.pipeline_mode<synchronous>, transform_indices = @transform_3, window_bounds = array<i64: 128, 128>}, {pipeline_mode = #tpu.pipeline_mode<synchronous>, transform_indices = @transform_4, window_bounds = array<i64: 1, 128>}, {pipeline_mode = #tpu.pipeline_mode<synchronous>, transform_indices = @transform_5, window_bounds = array<i64: 128, 128>}, {pipeline_mode = #tpu.pipeline_mode<synchronous>, transform_indices = @transform_6, window_bounds = array<i64: 1, 128>}, {pipeline_mode = #tpu.pipeline_mode<synchronous>, transform_indices = @transform_7, window_bounds = array<i64: 128, 128>}, {pipeline_mode = #tpu.pipeline_mode<synchronous>, transform_indices = @transform_8, window_bounds = array<i64: 1, 128>}, {transform_indices = @transform_9, window_bounds = array<i64: 128, 128>}, {transform_indices = @transform_10, window_bounds = array<i64: 128, 128>}]} {
    %c0 = arith.constant 0 : index
    %c0_0 = arith.constant 0 : index
    %0 = vector.load %arg1[%c0, %c0_0] : memref<128x128xbf16, #tpu.memory_space<vmem>>, vector<128x128xbf16>
    %c0_1 = arith.constant 0 : index
    %c0_2 = arith.constant 0 : index
    %1 = vector.load %arg3[%c0_1, %c0_2] : memref<1x128xf32, #tpu.memory_space<vmem>>, vector<1x128xf32>
    %c0_3 = arith.constant 0 : index
    %c0_4 = arith.constant 0 : index
    %2 = vector.load %arg5[%c0_3, %c0_4] : memref<1x128xf32, #tpu.memory_space<vmem>>, vector<1x128xf32>
    %c0_5 = arith.constant 0 : index
    %c0_6 = arith.constant 0 : index
    %3 = vector.load %arg7[%c0_5, %c0_6] : memref<1x128xf32, #tpu.memory_space<vmem>>, vector<1x128xf32>
    %c0_7 = arith.constant 0 : index
    %c0_8 = arith.constant 0 : index
    %4 = vector.load %arg9[%c0_7, %c0_8] : memref<1x128xf32, #tpu.memory_space<vmem>>, vector<1x128xf32>
    %c0_9 = arith.constant 0 : index
    %c0_10 = arith.constant 0 : index
    %5 = vector.load %arg2[%c0_9, %c0_10] : memref<128x128xbf16, #tpu.memory_space<vmem>>, vector<128x128xbf16>
    %cst = arith.constant dense<0.000000e+00> : vector<128x128xf32>
    %6 = tpu.matmul %0, %5, %cst {dimension_numbers = #tpu.dot_dimension_numbers<[1], [0], [0], [1], [0, 0, 1, 1], [], []>} : vector<128x128xbf16>, vector<128x128xbf16>, vector<128x128xf32> -> vector<128x128xf32>
    %7 = vector.broadcast %1 : vector<1x128xf32> to vector<128x128xf32>
    %8 = arith.addf %6, %7 : vector<128x128xf32>
    %cst_11 = arith.constant 0.000000e+00 : f32
    %9 = vector.broadcast %cst_11 : f32 to vector<128x128xf32>
    %10 = arith.cmpf ogt, %8, %9 : vector<128x128xf32>
    %cst_12 = arith.constant 0.00999999977 : f32
    %11 = vector.broadcast %cst_12 : f32 to vector<128x128xf32>
    %12 = arith.mulf %11, %8 : vector<128x128xf32>
    %13 = arith.select %10, %8, %12 : vector<128x128xi1>, vector<128x128xf32>
    %14 = arith.truncf %13 : vector<128x128xf32> to vector<128x128xbf16>
    %c0_13 = arith.constant 0 : index
    %c0_14 = arith.constant 0 : index
    %15 = vector.load %arg4[%c0_13, %c0_14] : memref<128x128xbf16, #tpu.memory_space<vmem>>, vector<128x128xbf16>
    %cst_15 = arith.constant dense<0.000000e+00> : vector<128x128xf32>
    %16 = tpu.matmul %14, %15, %cst_15 {dimension_numbers = #tpu.dot_dimension_numbers<[1], [0], [0], [1], [0, 0, 1, 1], [], []>} : vector<128x128xbf16>, vector<128x128xbf16>, vector<128x128xf32> -> vector<128x128xf32>
    %17 = vector.broadcast %2 : vector<1x128xf32> to vector<128x128xf32>
    %18 = arith.addf %16, %17 : vector<128x128xf32>
    %cst_16 = arith.constant 0.000000e+00 : f32
    %19 = vector.broadcast %cst_16 : f32 to vector<128x128xf32>
    %20 = arith.cmpf ogt, %18, %19 : vector<128x128xf32>
    %cst_17 = arith.constant 0.00999999977 : f32
    %21 = vector.broadcast %cst_17 : f32 to vector<128x128xf32>
    %22 = arith.mulf %21, %18 : vector<128x128xf32>
    %23 = arith.select %20, %18, %22 : vector<128x128xi1>, vector<128x128xf32>
    %24 = arith.truncf %23 : vector<128x128xf32> to vector<128x128xbf16>
    %c0_18 = arith.constant 0 : index
    %c0_19 = arith.constant 0 : index
    %25 = vector.load %arg6[%c0_18, %c0_19] : memref<128x128xbf16, #tpu.memory_space<vmem>>, vector<128x128xbf16>
    %cst_20 = arith.constant dense<0.000000e+00> : vector<128x128xf32>
    %26 = tpu.matmul %24, %25, %cst_20 {dimension_numbers = #tpu.dot_dimension_numbers<[1], [0], [0], [1], [0, 0, 1, 1], [], []>} : vector<128x128xbf16>, vector<128x128xbf16>, vector<128x128xf32> -> vector<128x128xf32>
    %27 = vector.broadcast %3 : vector<1x128xf32> to vector<128x128xf32>
    %28 = arith.addf %26, %27 : vector<128x128xf32>
    %cst_21 = arith.constant 0.000000e+00 : f32
    %29 = vector.broadcast %cst_21 : f32 to vector<128x128xf32>
    %30 = arith.cmpf ogt, %28, %29 : vector<128x128xf32>
    %cst_22 = arith.constant 0.00999999977 : f32
    %31 = vector.broadcast %cst_22 : f32 to vector<128x128xf32>
    %32 = arith.mulf %31, %28 : vector<128x128xf32>
    %33 = arith.select %30, %28, %32 : vector<128x128xi1>, vector<128x128xf32>
    %34 = arith.truncf %33 : vector<128x128xf32> to vector<128x128xbf16>
    %c0_23 = arith.constant 0 : index
    %c0_24 = arith.constant 0 : index
    %35 = vector.load %arg8[%c0_23, %c0_24] : memref<128x128xbf16, #tpu.memory_space<vmem>>, vector<128x128xbf16>
    %cst_25 = arith.constant dense<0.000000e+00> : vector<128x128xf32>
    %36 = tpu.matmul %34, %35, %cst_25 {dimension_numbers = #tpu.dot_dimension_numbers<[1], [0], [0], [1], [0, 0, 1, 1], [], []>} : vector<128x128xbf16>, vector<128x128xbf16>, vector<128x128xf32> -> vector<128x128xf32>
    %37 = vector.broadcast %4 : vector<1x128xf32> to vector<128x128xf32>
    %38 = arith.addf %36, %37 : vector<128x128xf32>
    %cst_26 = arith.constant 0.000000e+00 : f32
    %39 = vector.broadcast %cst_26 : f32 to vector<128x128xf32>
    %40 = arith.subf %39, %38 : vector<128x128xf32>
    %41 = math.exp %40 : vector<128x128xf32>
    %cst_27 = arith.constant 1.000000e+00 : f32
    %42 = vector.broadcast %cst_27 : f32 to vector<128x128xf32>
    %43 = arith.addf %42, %41 : vector<128x128xf32>
    %44 = tpu.reciprocal %43 {approx = true} : vector<128x128xf32> -> vector<128x128xf32>
    %c0_28 = arith.constant 0 : index
    %c0_29 = arith.constant 0 : index
    %45 = vector.load %arg10[%c0_28, %c0_29] : memref<128x128xf32, #tpu.memory_space<vmem>>, vector<128x128xf32>
    tpu.vector_store %arg10[%c0_28, %c0_29], %23 {strides = array<i32>} : memref<128x128xf32, #tpu.memory_space<vmem>>, vector<128x128xf32>,
    %c0_30 = arith.constant 0 : index
    %c0_31 = arith.constant 0 : index
    %46 = vector.load %arg11[%c0_30, %c0_31] : memref<128x128xf32, #tpu.memory_space<vmem>>, vector<128x128xf32>
    tpu.vector_store %arg11[%c0_30, %c0_31], %44 {strides = array<i32>} : memref<128x128xf32, #tpu.memory_space<vmem>>, vector<128x128xf32>,
    return
  }
  func.func @transform_0(%arg0: i32) -> (i32, i32) {
    %c0_i32 = arith.constant 0 : i32
    %c0_i32_0 = arith.constant 0 : i32
    return %arg0, %c0_i32 : i32, i32
  }
  func.func @transform_1(%arg0: i32) -> (i32, i32) {
    %c0_i32 = arith.constant 0 : i32
    %c0_i32_0 = arith.constant 0 : i32
    %c0_i32_1 = arith.constant 0 : i32
    return %c0_i32, %c0_i32_0 : i32, i32
  }
  func.func @transform_2(%arg0: i32) -> (i32, i32) {
    %c0_i32 = arith.constant 0 : i32
    %c0_i32_0 = arith.constant 0 : i32
    %c0_i32_1 = arith.constant 0 : i32
    return %c0_i32, %c0_i32_0 : i32, i32
  }
  func.func @transform_3(%arg0: i32) -> (i32, i32) {
    %c0_i32 = arith.constant 0 : i32
    %c0_i32_0 = arith.constant 0 : i32
    %c0_i32_1 = arith.constant 0 : i32
    return %c0_i32, %c0_i32_0 : i32, i32
  }
  func.func @transform_4(%arg0: i32) -> (i32, i32) {
    %c0_i32 = arith.constant 0 : i32
    %c0_i32_0 = arith.constant 0 : i32
    %c0_i32_1 = arith.constant 0 : i32
    return %c0_i32, %c0_i32_0 : i32, i32
  }
  func.func @transform_5(%arg0: i32) -> (i32, i32) {
    %c0_i32 = arith.constant 0 : i32
    %c0_i32_0 = arith.constant 0 : i32
    %c0_i32_1 = arith.constant 0 : i32
    return %c0_i32, %c0_i32_0 : i32, i32
  }
  func.func @transform_6(%arg0: i32) -> (i32, i32) {
    %c0_i32 = arith.constant 0 : i32
    %c0_i32_0 = arith.constant 0 : i32
    %c0_i32_1 = arith.constant 0 : i32
    return %c0_i32, %c0_i32_0 : i32, i32
  }
  func.func @transform_7(%arg0: i32) -> (i32, i32) {
    %c0_i32 = arith.constant 0 : i32
    %c0_i32_0 = arith.constant 0 : i32
    %c0_i32_1 = arith.constant 0 : i32
    return %c0_i32, %c0_i32_0 : i32, i32
  }
  func.func @transform_8(%arg0: i32) -> (i32, i32) {
    %c0_i32 = arith.constant 0 : i32
    %c0_i32_0 = arith.constant 0 : i32
    %c0_i32_1 = arith.constant 0 : i32
    return %c0_i32, %c0_i32_0 : i32, i32
  }
  func.func @transform_9(%arg0: i32) -> (i32, i32) {
    %c0_i32 = arith.constant 0 : i32
    %c0_i32_0 = arith.constant 0 : i32
    return %arg0, %c0_i32 : i32, i32
  }
  func.func @transform_10(%arg0: i32) -> (i32, i32) {
    %c0_i32 = arith.constant 0 : i32
    %c0_i32_0 = arith.constant 0 : i32
    return %arg0, %c0_i32 : i32, i32
  }
}

</mosaic_0001>

<bundles_post_ra>
// kernel: autoencoder_forward.1
= control target key start
LH: loop header
LB: loop body
LE: loop exit
PB: predicated region body
PF: predicated region fallthrough
CT: control target
= control target key end

     0   :  { %s1908_s13 = smov 0   ;;  %s2162_s0 = inlined_call_operand.vmem [shape: bf16[256,128], index: 0, kind: input, shape index: {}]   ;;  %s2163_s1 = inlined_call_operand.vmem [shape: bf16[128,128], index: 1, kind: input, shape index: {}]   ;;  %s2164_s2 = inlined_call_operand.vmem [shape: f32[1,128], index: 2, kind: input, shape index: {}]   ;;  %s2165_s3 = inlined_call_operand.vmem [shape: bf16[128,128], index: 3, kind: input, shape index: {}]   ;;  %s2166_s4 = inlined_call_operand.vmem [shape: f32[1,128], index: 4, kind: input, shape index: {}]   ;;  %s2167_s5 = inlined_call_operand.vmem [shape: bf16[128,128], index: 5, kind: input, shape index: {}]   ;;  %s2168_s6 = inlined_call_operand.vmem [shape: f32[1,128], index: 6, kind: input, shape index: {}]   ;;  %s2169_s7 = inlined_call_operand.vmem [shape: bf16[128,128], index: 7, kind: input, shape index: {}]   ;;  %s2170_s8 = inlined_call_operand.vmem [shape: f32[1,128], index: 8, kind: input, shape index: {}]   ;;  %s2171_s9 = inlined_call_operand.vmem [shape: f32[256,128], index: 9, kind: output, shape index: {0}]   ;;  %s2172_s10 = inlined_call_operand.vmem [shape: f32[256,128], index: 10, kind: output, shape index: {1}]  }
   0x1 LB: > { %s1484_s14 = sadd.s32 4294967295, %s1851_s13   ;;  %p1488_p0 = scmp.ge.s32.totalorder %s1851_s13, 1  ;;  %s1851_s13 = sphi %s1908_s13, %s21_s13  }
   0x2   : > { %p316_p1 = scmp.lt.s32.totalorder %s1851_s13, 3 }
   0x4   : > { %p317_p2 = pnand %p1488_p0, %p316_p1 }
   0x5   : > { %v1741_v0 = vld [vmem:[%s2163_s1] sm:$0xff] (!%p317_p2)   ;;  %s1489_s17 = sshll.u32 (!%p317_p2), %s1484_s14, 4  ;;  %v1742_v1 = vld [vmem:[%s2163_s1 + $0x8] sm:$0xff] (!%p317_p2)   ;;  %v1743_v2 = vld [vmem:[%s2163_s1 + $0x10] sm:$0xff] (!%p317_p2)  }
   0x6   : > { %320 = sbr.rel (%p317_p2) target bundleno = 978 (0x3d2), region = 56  ;;  %p360_p3 = scmp.lt.s32.totalorder (!%p317_p2), %s1489_s17, 31  ;;  %1605 = vmatprep.subr.bf16.mxu0 (!%p317_p2), %v1741_v0  ;;  %v1744_v3 = vld [vmem:[%s2163_s1 + $0x18] sm:$0xff] (!%p317_p2)   ;;  %v1745_v5 = vld [vmem:[%s2163_s1 + $0x20] sm:$0xff] (!%p317_p2)   ;;  %v1746_v6 = vld [vmem:[%s2163_s1 + $0x28] sm:$0xff] (!%p317_p2)  }
   0x7   : > { %1606 = vmatpush3.bf16.msra.mxu0 (!%p317_p2), %v1741_v0  ;;  %v1757_v7 = vld [vmem:[%s2165_s3] sm:$0xff] (!%p317_p2)   ;;  %v1758_v8 = vld [vmem:[%s2165_s3 + $0x8] sm:$0xff] (!%p317_p2)   ;;  %v1747_v9 = vld [vmem:[%s2163_s1 + $0x30] sm:$0xff] (!%p317_p2)  }
   0x8   : > { %1607 = vmatprep.subr.bf16.mxu0 (!%p317_p2), %v1742_v1  ;;  %1637 = vmatprep.subr.bf16.mxu1 (!%p317_p2), %v1757_v7  ;;  %v1759_v10 = vld [vmem:[%s2165_s3 + $0x10] sm:$0xff] (!%p317_p2)   ;;  %v1748_v11 = vld [vmem:[%s2163_s1 + $0x38] sm:$0xff] (!%p317_p2)   ;;  %v1761_v13 = vld [vmem:[%s2165_s3 + $0x20] sm:$0xff] (!%p317_p2)  }
   0x9   : > { %1638 = vmatpush3.bf16.msra.mxu1 (!%p317_p2), %v1757_v7  ;;  %v1760_v12 = vld [vmem:[%s2165_s3 + $0x18] sm:$0xff] (!%p317_p2)   ;;  %v1762_v21 = vld [vmem:[%s2165_s3 + $0x28] sm:$0xff] (!%p317_p2)   ;;  %v1763_v22 = vld [vmem:[%s2165_s3 + $0x30] sm:$0xff] (!%p317_p2)  }
   0xa   : > { %1639 = vmatprep.subr.bf16.mxu1 (!%p317_p2), %v1758_v8  ;;  %v1764_v23 = vld [vmem:[%s2165_s3 + $0x38] sm:$0xff] (!%p317_p2)   ;;  %v1765_v24 = vld [vmem:[%s2167_s5] sm:$0xff] (!%p317_p2)   ;;  %v1766_v25 = vld [vmem:[%s2167_s5 + $0x8] sm:$0xff] (!%p317_p2)  }
   0xb   : > { %1608 = vmatpush3.bf16.msra.mxu0 (!%p317_p2), %v1742_v1  ;;  %v1767_v26 = vld [vmem:[%s2167_s5 + $0x10] sm:$0xff] (!%p317_p2)   ;;  %v1768_v27 = vld [vmem:[%s2167_s5 + $0x18] sm:$0xff] (!%p317_p2)   ;;  %v1769_v28 = vld [vmem:[%s2167_s5 + $0x20] sm:$0xff] (!%p317_p2)  }
   0xc   : > { %1609 = vmatprep.subr.bf16.mxu0 (!%p317_p2), %v1743_v2  ;;  %v1770_v29 = vld [vmem:[%s2167_s5 + $0x28] sm:$0xff] (!%p317_p2)   ;;  %v2001_v30 = vld [vmem:[%s2164_s2] ss:$0 sm:$0xff] (!%p317_p2) }
   0xd   : > { %s2174_s17 = smov (!%p360_p3, %s1489_s17), 31  ;;  %1640 = vmatpush3.bf16.msra.mxu1 %v1758_v8 }
   0xe   : > { %s1490_s22 = sshll.u32 %s2174_s17, 2  ;;  %1641 = vmatprep.subr.bf16.mxu1 %v1759_v10  ;;  %s1492_s11 = sshll.u32 %s2174_s17, 3 }
   0xf   : > { %s1931_s25 = scalar_lea.vmem %s2162_s0, %s1490_s22  ;;  %1610 = vmatpush3.bf16.msra.mxu0 %v1743_v2  ;;  %s2056_s15 = scalar_lea.vmem %s2171_s9, %s1492_s11 }
  0x10   : > { %v1749_v4 = vld [vmem:[%s1931_s25] sm:$0xff]   ;;  %1611 = vmatprep.subr.bf16.mxu0 %v1744_v3  ;;  %v1750_v14 = vld [vmem:[%s1931_s25 + $0x8] sm:$0xff]   ;;  %v1751_v15 = vld [vmem:[%s1931_s25 + $0x10] sm:$0xff]   ;;  %s2140_s27 = scalar_lea.vmem %s2172_s10, %s1492_s11 }
  0x11   : > { %1621 = vmatprep.mubr.bf16.mxu0 %v1749_v4  ;;  %1642 = vmatpush3.bf16.msra.mxu1 %v1759_v10  ;;  %v1752_v16 = vld [vmem:[%s1931_s25 + $0x18] sm:$0xff]   ;;  %v1753_v17 = vld [vmem:[%s1931_s25 + $0x20] sm:$0xff]   ;;  %v1754_v18 = vld [vmem:[%s1931_s25 + $0x28] sm:$0xff]  }
  0x12   : > { %1643 = vmatprep.subr.bf16.mxu1 %v1760_v12  ;;  %v1755_v19 = vld [vmem:[%s1931_s25 + $0x30] sm:$0xff]   ;;  %v1756_v20 = vld [vmem:[%s1931_s25 + $0x38] sm:$0xff]  }
  0x13   : > { %1612 = vmatpush3.bf16.msra.mxu0 %v1744_v3 }
  0x14   : > { %1613 = vmatprep.subr.bf16.mxu0 %v1745_v5 }
  0x15   : > { %1644 = vmatpush3.bf16.msra.mxu1 %v1760_v12 }
  0x16   : > { %1645 = vmatprep.subr.bf16.mxu1 %v1761_v13 }
  0x17   : > { %1614 = vmatpush3.bf16.msra.mxu0 %v1745_v5 }
  0x18   : > { %1615 = vmatprep.subr.bf16.mxu0 %v1746_v6 }
  0x19   : > { %1646 = vmatpush3.bf16.msra.mxu1 %v1761_v13 }
  0x1a   : > { %1647 = vmatprep.subr.bf16.mxu1 %v1762_v21 }
  0x1b   : > { %1616 = vmatpush3.bf16.msra.mxu0 %v1746_v6 }
  0x1c   : > { %1617 = vmatprep.subr.bf16.mxu0 %v1747_v9 }
  0x1d   : > { %1648 = vmatpush3.bf16.msra.mxu1 %v1762_v21 }
  0x1e   : > { %1649 = vmatprep.subr.bf16.mxu1 %v1763_v22 }
  0x1f   : > { %1618 = vmatpush3.bf16.msra.mxu0 %v1747_v9 }
  0x20   : > { %1619 = vmatprep.subr.bf16.mxu0 %v1748_v11 }
  0x21   : > { %1650 = vmatpush3.bf16.msra.mxu1 %v1763_v22 }
  0x22   : > { %1651 = vmatprep.subr.bf16.mxu1 %v1764_v23 }
  0x23   : > { %1620 = vmatpush3.bf16.msra.mxu0 %v1748_v11 }
  0x24   : > { %1669 = vmatprep.subr.bf16.mxu0 %v1765_v24 }
  0x25   : > { %1652 = vmatpush3.bf16.msra.mxu1 %v1764_v23 }
  0x26   : > { %1622 = vmatmul.mubr.bf16.vlgmr.msra.gmra.mrb[0].mxu0 %v1750_v14 }
  0x27   : > { %1625 = vmatprep.mubr.bf16.mxu0 %v1751_v15  ;;  %1670 = vmatpush3.bf16.msra.mxu0 %v1765_v24 }
  0x28   : > { %1671 = vmatprep.subr.bf16.mxu0 %v1766_v25 }
  0x2b   : > { %1672 = vmatpush3.bf16.msra.mxu0 %v1766_v25 }
  0x2c   : > { %1673 = vmatprep.subr.bf16.mxu0 %v1767_v26 }
  0x2e   : > { %1626 = vmatmul.mubr.bf16.gmra.mrb[4].mxu0 %v1752_v16 }
  0x2f   : > { %1629 = vmatprep.mubr.bf16.mxu0 %v1753_v17  ;;  %1674 = vmatpush3.bf16.msra.mxu0 %v1767_v26 }
  0x30   : > { %1675 = vmatprep.subr.bf16.mxu0 %v1768_v27 }
  0x33   : > { %1676 = vmatpush3.bf16.msra.mxu0 %v1768_v27 }
  0x34   : > { %1677 = vmatprep.subr.bf16.mxu0 %v1769_v28 }
  0x36   : > { %1630 = vmatmul.mubr.bf16.gmra.mrb[8].mxu0 %v1754_v18 }
  0x37   : > { %1633 = vmatprep.mubr.bf16.mxu0 %v1755_v19  ;;  %1678 = vmatpush3.bf16.msra.mxu0 %v1769_v28 }
  0x38   : > { %1679 = vmatprep.subr.bf16.mxu0 %v1770_v29 }
  0x3b   : > { %1680 = vmatpush3.bf16.msra.mxu0 %v1770_v29 }
  0x3e   : > { %1634 = vmatmul.mubr.bf16.gmra.mrb[12].mxu0 %v1756_v20 }
  0xf9   : > { %v1623_v31 = vpop.f32.mrb[0].mxu0 }
  0xfa   : > { %v559_v32 = vadd.f32 %v1623_v31, %v2001_v30  ;;  %v550_v33 = vpop.f32.mrb[1].mxu0 }
  0xfb   : > { %v551_v34 = vadd.f32 %v2001_v30, %v550_v33  ;;  %v1624_v35 = vpop.f32.mrb[2].mxu0 }
  0xfc   : > { %v631_v36 = vmul.f32 0.01, %v559_v32  ;;  %v562_v37 = vadd.f32 %v1624_v35, %v2001_v30  ;;  %v553_v38 = vpop.f32.mrb[3].mxu0  ;;  %vm615_vm0 = vcmp.gt.f32.partialorder %v559_v32, 0.0 }
  0xfd   : > { %v629_v39 = vmul.f32 0.01, %v551_v34  ;;  %v554_v40 = vadd.f32 %v2001_v30, %v553_v38  ;;  %vm613_vm2 = vcmp.gt.f32.partialorder %v551_v34, 0.0 }
  0xfe   : > { %vm616_vm1 = vcmp.gt.f32.partialorder %v562_v37, 0.0  ;;  %v632_v41 = vmul.f32 0.01, %v562_v37  ;;  %v647_v43 = vsel %vm615_vm0, %v559_v32, %v631_v36 }
  0xff   : > { %v630_v42 = vmul.f32 0.01, %v554_v40  ;;  %vm614_vm3 = vcmp.gt.f32.partialorder %v554_v40, 0.0  ;;  %v645_v46 = vsel %vm613_vm2, %v551_v34, %v629_v39 }
 0x100   : > { %v648_v44 = vsel %vm616_vm1, %v562_v37, %v632_v41  ;;  %v1773_v41 = vld [vmem:[%s2169_s7] sm:$0xff]  }
 0x101   : > { %v1627_v45 = vpop.f32.mrb[4].mxu0  ;;  %v646_v47 = vsel %vm614_vm3, %v554_v40, %v630_v42  ;;  %v662_v48 = vpack.c.bf16 %v648_v44, %v647_v43  ;;  %v1771_v40 = vld [vmem:[%s2167_s5 + $0x30] sm:$0xff]   ;;  %v1774_v42 = vld [vmem:[%s2169_s7 + $0x8] sm:$0xff]   ;;  %1701 = vmatprep.subr.bf16.mxu1 %v1773_v41  ;;  %v1776_v44 = vld [vmem:[%s2169_s7 + $0x18] sm:$0xff]  }
 0x102   : > { %v575_v49 = vadd.f32 %v1627_v45, %v2001_v30  ;;  %v566_v50 = vpop.f32.mrb[5].mxu0  ;;  %v661_v51 = vpack.c.bf16 %v646_v47, %v645_v46  ;;  %1681 = vmatprep.subr.bf16.mxu0 %v1771_v40  ;;  %v1775_v43 = vld [vmem:[%s2169_s7 + $0x10] sm:$0xff]   ;;  %v1777_v45 = vld [vmem:[%s2169_s7 + $0x20] sm:$0xff]   ;;  %v1778_v46 = vld [vmem:[%s2169_s7 + $0x28] sm:$0xff]  }
 0x103   : > { %v567_v52 = vadd.f32 %v2001_v30, %v566_v50  ;;  %v1628_v53 = vpop.f32.mrb[6].mxu0  ;;  %1682 = vmatpush3.bf16.msra.mxu0 %v1771_v40  ;;  %v2046_v47 = vld [vmem:[%s2166_s4] ss:$0 sm:$0xff] }
 0x104   : > { %v635_v54 = vmul.f32 0.01, %v575_v49  ;;  %v578_v55 = vadd.f32 %v1628_v53, %v2001_v30  ;;  %v569_v56 = vpop.f32.mrb[7].mxu0  ;;  %1653 = vmatprep.mubr.bf16.mxu1 %v661_v51  ;;  %vm619_vm4 = vcmp.gt.f32.partialorder %v575_v49, 0.0 }
 0x105   : > { %v633_v57 = vmul.f32 0.01, %v567_v52  ;;  %v570_v58 = vadd.f32 %v2001_v30, %v569_v56  ;;  %1654 = vmatmul.mubr.bf16.vlgmr.msra.gmra.mrb[0].mxu1 %v662_v48  ;;  %vm617_vm5 = vcmp.gt.f32.partialorder %v567_v52, 0.0 }
 0x106   : > { %vm620_vm6 = vcmp.gt.f32.partialorder %v578_v55, 0.0  ;;  %v636_v59 = vmul.f32 0.01, %v578_v55  ;;  %v651_v61 = vsel %vm619_vm4, %v575_v49, %v635_v54  ;;  %1702 = vmatpush3.bf16.msra.mxu1 %v1773_v41 }
 0x107   : > { %vm618_vm7 = vcmp.gt.f32.partialorder %v570_v58, 0.0  ;;  %v634_v60 = vmul.f32 0.01, %v570_v58  ;;  %v649_v0 = vsel %vm617_vm5, %v567_v52, %v633_v57  ;;  %1703 = vmatprep.subr.bf16.mxu1 %v1774_v42 }
 0x108   : > { %v652_v62 = vsel %vm620_vm6, %v578_v55, %v636_v59 }
 0x109   : > { %v1631_v63 = vpop.f32.mrb[8].mxu0  ;;  %v650_v1 = vsel %vm618_vm7, %v570_v58, %v634_v60  ;;  %v664_v2 = vpack.c.bf16 %v652_v62, %v651_v61 }
 0x10a   : > { %v591_v3 = vadd.f32 %v1631_v63, %v2001_v30  ;;  %v582_v4 = vpop.f32.mrb[9].mxu0  ;;  %v663_v5 = vpack.c.bf16 %v650_v1, %v649_v0  ;;  %1704 = vmatpush3.bf16.msra.mxu1 %v1774_v42 }
 0x10b   : > { %v583_v6 = vadd.f32 %v2001_v30, %v582_v4  ;;  %v1632_v7 = vpop.f32.mrb[10].mxu0  ;;  %1705 = vmatprep.subr.bf16.mxu1 %v1775_v43 }
 0x10c   : > { %v639_v8 = vmul.f32 0.01, %v591_v3  ;;  %v594_v9 = vadd.f32 %v1632_v7, %v2001_v30  ;;  %v585_v10 = vpop.f32.mrb[11].mxu0  ;;  %1657 = vmatprep.mubr.bf16.mxu1 %v663_v5  ;;  %vm623_vm8 = vcmp.gt.f32.partialorder %v591_v3, 0.0 }
 0x10d   : > { %v637_v11 = vmul.f32 0.01, %v583_v6  ;;  %v586_v12 = vadd.f32 %v2001_v30, %v585_v10  ;;  %1658 = vmatmul.mubr.bf16.gmra.mrb[4].mxu1 %v664_v2  ;;  %vm621_vm9 = vcmp.gt.f32.partialorder %v583_v6, 0.0 }
 0x10e   : > { %vm624_vm10 = vcmp.gt.f32.partialorder %v594_v9, 0.0  ;;  %v640_v13 = vmul.f32 0.01, %v594_v9  ;;  %v655_v15 = vsel %vm623_vm8, %v591_v3, %v639_v8  ;;  %1706 = vmatpush3.bf16.msra.mxu1 %v1775_v43 }
 0x10f   : > { %vm622_vm11 = vcmp.gt.f32.partialorder %v586_v12, 0.0  ;;  %v638_v14 = vmul.f32 0.01, %v586_v12  ;;  %v653_v18 = vsel %vm621_vm9, %v583_v6, %v637_v11  ;;  %1707 = vmatprep.subr.bf16.mxu1 %v1776_v44 }
 0x110   : > { %v656_v16 = vsel %vm624_vm10, %v594_v9, %v640_v13 }
 0x111   : > { %v1635_v17 = vpop.f32.mrb[12].mxu0  ;;  %v654_v19 = vsel %vm622_vm11, %v586_v12, %v638_v14  ;;  %v666_v20 = vpack.c.bf16 %v656_v16, %v655_v15 }
 0x112   : > { %v607_v21 = vadd.f32 %v1635_v17, %v2001_v30  ;;  %v598_v22 = vpop.f32.mrb[13].mxu0  ;;  %v665_v23 = vpack.c.bf16 %v654_v19, %v653_v18  ;;  %1708 = vmatpush3.bf16.msra.mxu1 %v1776_v44 }
 0x113   : > { %v599_v24 = vadd.f32 %v2001_v30, %v598_v22  ;;  %v1636_v25 = vpop.f32.mrb[14].mxu0  ;;  %1709 = vmatprep.subr.bf16.mxu1 %v1777_v45 }
 0x114   : > { %v643_v26 = vmul.f32 0.01, %v607_v21  ;;  %v610_v27 = vadd.f32 %v1636_v25, %v2001_v30  ;;  %v601_v28 = vpop.f32.mrb[15].mxu0  ;;  %1661 = vmatprep.mubr.bf16.mxu1 %v665_v23  ;;  %vm627_vm12 = vcmp.gt.f32.partialorder %v607_v21, 0.0 }
 0x115   : > { %v641_v29 = vmul.f32 0.01, %v599_v24  ;;  %v602_v31 = vadd.f32 %v2001_v30, %v601_v28  ;;  %1662 = vmatmul.mubr.bf16.gmra.mrb[8].mxu1 %v666_v20  ;;  %vm625_vm13 = vcmp.gt.f32.partialorder %v599_v24, 0.0  ;;  %v1772_v30 = vld [vmem:[%s2167_s5 + $0x38] sm:$0xff]  }
 0x116   : > { %vm628_vm14 = vcmp.gt.f32.partialorder %v610_v27, 0.0  ;;  %v644_v32 = vmul.f32 0.01, %v610_v27  ;;  %v659_v34 = vsel %vm627_vm12, %v607_v21, %v643_v26  ;;  %1683 = vmatprep.subr.bf16.mxu0 %v1772_v30  ;;  %1710 = vmatpush3.bf16.msra.mxu1 %v1777_v45 }
 0x117   : > { %vm626_vm15 = vcmp.gt.f32.partialorder %v602_v31, 0.0  ;;  %v642_v33 = vmul.f32 0.01, %v602_v31  ;;  %v657_v36 = vsel %vm625_vm13, %v599_v24, %v641_v29  ;;  %1684 = vmatpush3.bf16.msra.mxu0 %v1772_v30  ;;  %1711 = vmatprep.subr.bf16.mxu1 %v1778_v46 }
 0x118   : > { %v660_v35 = vsel %vm628_vm14, %v610_v27, %v644_v32 }
 0x119   : > { %v658_v37 = vsel %vm626_vm15, %v602_v31, %v642_v33  ;;  %v668_v38 = vpack.c.bf16 %v660_v35, %v659_v34 }
 0x11a   : > { %v667_v39 = vpack.c.bf16 %v658_v37, %v657_v36  ;;  %1712 = vmatpush3.bf16.msra.mxu1 %v1778_v46 }
 0x11c   : > { %1665 = vmatprep.mubr.bf16.mxu1 %v667_v39 }
 0x11d   : > { %1666 = vmatmul.mubr.bf16.gmra.mrb[12].mxu1 %v668_v38 }
 0x1d8   : > { %v1655_v48 = vpop.f32.mrb[0].mxu1 }
 0x1d9   : > { %v782_v49 = vadd.f32 %v1655_v48, %v2046_v47  ;;  %v773_v50 = vpop.f32.mrb[1].mxu1 }
 0x1da   : > { %v774_v51 = vadd.f32 %v2046_v47, %v773_v50  ;;  %v1656_v52 = vpop.f32.mrb[2].mxu1 }
 0x1db   : > { %vm838_vm0 = vcmp.gt.f32.partialorder %v782_v49, 0.0  ;;  %v854_v53 = vmul.f32 0.01, %v782_v49  ;;  %v785_v54 = vadd.f32 %v1656_v52, %v2046_v47  ;;  %v776_v55 = vpop.f32.mrb[3].mxu1 }
 0x1dc   : > { %vm836_vm1 = vcmp.gt.f32.partialorder %v774_v51, 0.0  ;;  %v852_v56 = vmul.f32 0.01, %v774_v51  ;;  %v777_v57 = vadd.f32 %v2046_v47, %v776_v55 }
 0x1dd   : > { %v870_v58 = vsel %vm838_vm0, %v782_v49, %v854_v53  ;;  %vm839_vm2 = vcmp.gt.f32.partialorder %v785_v54, 0.0  ;;  %v855_v59 = vmul.f32 0.01, %v785_v54 }
 0x1de   : > { %1364 = vst [vmem:[%s2056_s15 + $0x10] sm:$0xff] %v870_v58  ;;  %vm837_vm3 = vcmp.gt.f32.partialorder %v777_v57, 0.0  ;;  %v853_v60 = vmul.f32 0.01, %v777_v57  ;;  %v868_v61 = vsel %vm836_vm1, %v774_v51, %v852_v56 }
 0x1df   : > { %v871_v62 = vsel %vm839_vm2, %v785_v54, %v855_v59  ;;  %1362 = vst [vmem:[%s2056_s15] sm:$0xff] %v868_v61 }
 0x1e0   : > { %v885_v63 = vpack.c.bf16 %v871_v62, %v870_v58  ;;  %1365 = vst [vmem:[%s2056_s15 + $0x18] sm:$0xff] %v871_v62  ;;  %v1659_v0 = vpop.f32.mrb[4].mxu1  ;;  %v869_v1 = vsel %vm837_vm3, %v777_v57, %v853_v60  ;;  %v1780_v57 = vld [vmem:[%s2169_s7 + $0x38] sm:$0xff]   ;;  %v2097_v58 = vld [vmem:[%s2168_s6] ss:$0 sm:$0xff] }
 0x1e1   : > { %v798_v2 = vadd.f32 %v1659_v0, %v2046_v47  ;;  %v789_v3 = vpop.f32.mrb[5].mxu1  ;;  %v884_v4 = vpack.c.bf16 %v869_v1, %v868_v61  ;;  %1363 = vst [vmem:[%s2056_s15 + $0x8] sm:$0xff] %v869_v1 }
 0x1e2   : > { %v790_v5 = vadd.f32 %v2046_v47, %v789_v3  ;;  %v1660_v6 = vpop.f32.mrb[6].mxu1 }
 0x1e3   : > { %vm842_vm4 = vcmp.gt.f32.partialorder %v798_v2, 0.0  ;;  %v858_v7 = vmul.f32 0.01, %v798_v2  ;;  %v801_v8 = vadd.f32 %v1660_v6, %v2046_v47  ;;  %v792_v9 = vpop.f32.mrb[7].mxu1  ;;  %1685 = vmatprep.mubr.bf16.mxu0 %v884_v4 }
 0x1e4   : > { %vm840_vm5 = vcmp.gt.f32.partialorder %v790_v5, 0.0  ;;  %v856_v10 = vmul.f32 0.01, %v790_v5  ;;  %v793_v11 = vadd.f32 %v2046_v47, %v792_v9  ;;  %1686 = vmatmul.mubr.bf16.vlgmr.msra.gmra.mrb[16].mxu0 %v885_v63 }
 0x1e5   : > { %vm843_vm6 = vcmp.gt.f32.partialorder %v801_v8, 0.0  ;;  %v859_v12 = vmul.f32 0.01, %v801_v8  ;;  %v874_v13 = vsel %vm842_vm4, %v798_v2, %v858_v7 }
 0x1e6   : > { %vm841_vm7 = vcmp.gt.f32.partialorder %v793_v11, 0.0  ;;  %v857_v14 = vmul.f32 0.01, %v793_v11  ;;  %v872_v15 = vsel %vm840_vm5, %v790_v5, %v856_v10  ;;  %1368 = vst [vmem:[%s2056_s15 + $0x30] sm:$0xff] %v874_v13 }
 0x1e7   : > { %1366 = vst [vmem:[%s2056_s15 + $0x20] sm:$0xff] %v872_v15  ;;  %v875_v16 = vsel %vm843_vm6, %v801_v8, %v859_v12 }
 0x1e8   : > { %v1663_v17 = vpop.f32.mrb[8].mxu1  ;;  %v873_v18 = vsel %vm841_vm7, %v793_v11, %v857_v14  ;;  %v887_v19 = vpack.c.bf16 %v875_v16, %v874_v13  ;;  %1369 = vst [vmem:[%s2056_s15 + $0x38] sm:$0xff] %v875_v16 }
 0x1e9   : > { %v814_v20 = vadd.f32 %v1663_v17, %v2046_v47  ;;  %v805_v21 = vpop.f32.mrb[9].mxu1  ;;  %v886_v22 = vpack.c.bf16 %v873_v18, %v872_v15  ;;  %1367 = vst [vmem:[%s2056_s15 + $0x28] sm:$0xff] %v873_v18 }
 0x1ea   : > { %v806_v23 = vadd.f32 %v2046_v47, %v805_v21  ;;  %v1664_v24 = vpop.f32.mrb[10].mxu1 }
 0x1eb   : > { %vm846_vm8 = vcmp.gt.f32.partialorder %v814_v20, 0.0  ;;  %v862_v25 = vmul.f32 0.01, %v814_v20  ;;  %v817_v26 = vadd.f32 %v1664_v24, %v2046_v47  ;;  %v808_v27 = vpop.f32.mrb[11].mxu1  ;;  %1689 = vmatprep.mubr.bf16.mxu0 %v886_v22 }
 0x1ec   : > { %vm844_vm9 = vcmp.gt.f32.partialorder %v806_v23, 0.0  ;;  %v860_v28 = vmul.f32 0.01, %v806_v23  ;;  %v809_v29 = vadd.f32 %v2046_v47, %v808_v27  ;;  %1690 = vmatmul.mubr.bf16.gmra.mrb[20].mxu0 %v887_v19 }
 0x1ed   : > { %vm847_vm10 = vcmp.gt.f32.partialorder %v817_v26, 0.0  ;;  %v863_v31 = vmul.f32 0.01, %v817_v26  ;;  %v878_v32 = vsel %vm846_vm8, %v814_v20, %v862_v25 }
 0x1ee   : > { %vm845_vm11 = vcmp.gt.f32.partialorder %v809_v29, 0.0  ;;  %v861_v33 = vmul.f32 0.01, %v809_v29  ;;  %v876_v34 = vsel %vm844_vm9, %v806_v23, %v860_v28  ;;  %1372 = vst [vmem:[%s2056_s15 + $0x50] sm:$0xff] %v878_v32 }
 0x1ef   : > { %1370 = vst [vmem:[%s2056_s15 + $0x40] sm:$0xff] %v876_v34  ;;  %v879_v35 = vsel %vm847_vm10, %v817_v26, %v863_v31 }
 0x1f0   : > { %v1667_v36 = vpop.f32.mrb[12].mxu1  ;;  %v877_v37 = vsel %vm845_vm11, %v809_v29, %v861_v33  ;;  %v889_v38 = vpack.c.bf16 %v879_v35, %v878_v32  ;;  %1373 = vst [vmem:[%s2056_s15 + $0x58] sm:$0xff] %v879_v35 }
 0x1f1   : > { %v830_v39 = vadd.f32 %v1667_v36, %v2046_v47  ;;  %v821_v40 = vpop.f32.mrb[13].mxu1  ;;  %v888_v30 = vpack.c.bf16 %v877_v37, %v876_v34  ;;  %1371 = vst [vmem:[%s2056_s15 + $0x48] sm:$0xff] %v877_v37 }
 0x1f2   : > { %v822_v41 = vadd.f32 %v2046_v47, %v821_v40  ;;  %v1668_v42 = vpop.f32.mrb[14].mxu1 }
 0x1f3   : > { %vm850_vm12 = vcmp.gt.f32.partialorder %v830_v39, 0.0  ;;  %v866_v43 = vmul.f32 0.01, %v830_v39  ;;  %v833_v44 = vadd.f32 %v1668_v42, %v2046_v47  ;;  %v824_v45 = vpop.f32.mrb[15].mxu1  ;;  %1693 = vmatprep.mubr.bf16.mxu0 %v888_v30 }
 0x1f4   : > { %vm848_vm13 = vcmp.gt.f32.partialorder %v822_v41, 0.0  ;;  %v864_v46 = vmul.f32 0.01, %v822_v41  ;;  %v825_v48 = vadd.f32 %v2046_v47, %v824_v45  ;;  %1694 = vmatmul.mubr.bf16.gmra.mrb[24].mxu0 %v889_v38  ;;  %v1779_v47 = vld [vmem:[%s2169_s7 + $0x30] sm:$0xff]  }
 0x1f5   : > { %vm851_vm14 = vcmp.gt.f32.partialorder %v833_v44, 0.0  ;;  %v867_v49 = vmul.f32 0.01, %v833_v44  ;;  %v882_v50 = vsel %vm850_vm12, %v830_v39, %v866_v43  ;;  %1713 = vmatprep.subr.bf16.mxu1 %v1779_v47 }
 0x1f6   : > { %vm849_vm15 = vcmp.gt.f32.partialorder %v825_v48, 0.0  ;;  %v865_v51 = vmul.f32 0.01, %v825_v48  ;;  %v880_v52 = vsel %vm848_vm13, %v822_v41, %v864_v46  ;;  %1376 = vst [vmem:[%s2056_s15 + $0x70] sm:$0xff] %v882_v50  ;;  %1714 = vmatpush3.bf16.msra.mxu1 %v1779_v47 }
 0x1f7   : > { %1374 = vst [vmem:[%s2056_s15 + $0x60] sm:$0xff] %v880_v52  ;;  %v883_v53 = vsel %vm851_vm14, %v833_v44, %v867_v49  ;;  %1715 = vmatprep.subr.bf16.mxu1 %v1780_v57 }
 0x1f8   : > { %v881_v54 = vsel %vm849_vm15, %v825_v48, %v865_v51  ;;  %v891_v55 = vpack.c.bf16 %v883_v53, %v882_v50  ;;  %1377 = vst [vmem:[%s2056_s15 + $0x78] sm:$0xff] %v883_v53 }
 0x1f9   : > { %v890_v56 = vpack.c.bf16 %v881_v54, %v880_v52  ;;  %1375 = vst [vmem:[%s2056_s15 + $0x68] sm:$0xff] %v881_v54 }
 0x1fa   : > { %1716 = vmatpush3.bf16.msra.mxu1 %v1780_v57 }
 0x1fb   : > { %1697 = vmatprep.mubr.bf16.mxu0 %v890_v56 }
 0x1fc   : > { %1698 = vmatmul.mubr.bf16.gmra.mrb[28].mxu0 %v891_v55 }
 0x2b7   : > { %v1687_v59 = vpop.f32.mrb[16].mxu0 }
 0x2b8   : > { %v1005_v60 = vadd.f32 %v1687_v59, %v2097_v58  ;;  %v996_v61 = vpop.f32.mrb[17].mxu0 }
 0x2b9   : > { %v997_v62 = vadd.f32 %v2097_v58, %v996_v61  ;;  %v1688_v63 = vpop.f32.mrb[18].mxu0 }
 0x2ba   : > { %v1077_v0 = vmul.f32 0.01, %v1005_v60  ;;  %v1008_v1 = vadd.f32 %v1688_v63, %v2097_v58  ;;  %v999_v2 = vpop.f32.mrb[19].mxu0  ;;  %vm1061_vm0 = vcmp.gt.f32.partialorder %v1005_v60, 0.0 }
 0x2bb   : > { %v1075_v3 = vmul.f32 0.01, %v997_v62  ;;  %v1000_v4 = vadd.f32 %v2097_v58, %v999_v2  ;;  %vm1059_vm1 = vcmp.gt.f32.partialorder %v997_v62, 0.0 }
 0x2bc   : > { %vm1062_vm2 = vcmp.gt.f32.partialorder %v1008_v1, 0.0  ;;  %v1078_v5 = vmul.f32 0.01, %v1008_v1  ;;  %v1093_v7 = vsel %vm1061_vm0, %v1005_v60, %v1077_v0 }
 0x2bd   : > { %vm1060_vm3 = vcmp.gt.f32.partialorder %v1000_v4, 0.0  ;;  %v1076_v6 = vmul.f32 0.01, %v1000_v4  ;;  %v1091_v11 = vsel %vm1059_vm1, %v997_v62, %v1075_v3 }
 0x2be   : > { %v1094_v8 = vsel %vm1062_vm2, %v1008_v1, %v1078_v5 }
 0x2bf   : > { %v1108_v9 = vpack.c.bf16 %v1094_v8, %v1093_v7  ;;  %v1691_v10 = vpop.f32.mrb[20].mxu0  ;;  %v1092_v12 = vsel %vm1060_vm3, %v1000_v4, %v1076_v6  ;;  %v2118_v4 = vld [vmem:[%s2170_s8] ss:$0 sm:$0xff] }
 0x2c0   : > { %v1021_v13 = vadd.f32 %v1691_v10, %v2097_v58  ;;  %v1012_v14 = vpop.f32.mrb[21].mxu0  ;;  %v1107_v15 = vpack.c.bf16 %v1092_v12, %v1091_v11 }
 0x2c1   : > { %v1013_v16 = vadd.f32 %v2097_v58, %v1012_v14  ;;  %v1692_v17 = vpop.f32.mrb[22].mxu0 }
 0x2c2   : > { %v1081_v18 = vmul.f32 0.01, %v1021_v13  ;;  %v1024_v19 = vadd.f32 %v1692_v17, %v2097_v58  ;;  %v1015_v20 = vpop.f32.mrb[23].mxu0  ;;  %1717 = vmatprep.mubr.bf16.mxu1 %v1107_v15  ;;  %vm1065_vm4 = vcmp.gt.f32.partialorder %v1021_v13, 0.0 }
 0x2c3   : > { %v1079_v21 = vmul.f32 0.01, %v1013_v16  ;;  %v1016_v22 = vadd.f32 %v2097_v58, %v1015_v20  ;;  %1718 = vmatmul.mubr.bf16.vlgmr.msra.gmra.mrb[16].mxu1 %v1108_v9  ;;  %vm1063_vm5 = vcmp.gt.f32.partialorder %v1013_v16, 0.0 }
 0x2c4   : > { %vm1066_vm6 = vcmp.gt.f32.partialorder %v1024_v19, 0.0  ;;  %v1082_v23 = vmul.f32 0.01, %v1024_v19  ;;  %v1097_v25 = vsel %vm1065_vm4, %v1021_v13, %v1081_v18 }
 0x2c5   : > { %vm1064_vm7 = vcmp.gt.f32.partialorder %v1016_v22, 0.0  ;;  %v1080_v24 = vmul.f32 0.01, %v1016_v22  ;;  %v1095_v28 = vsel %vm1063_vm5, %v1013_v16, %v1079_v21 }
 0x2c6   : > { %v1098_v26 = vsel %vm1066_vm6, %v1024_v19, %v1082_v23 }
 0x2c7   : > { %v1695_v27 = vpop.f32.mrb[24].mxu0  ;;  %v1096_v29 = vsel %vm1064_vm7, %v1016_v22, %v1080_v24  ;;  %v1110_v31 = vpack.c.bf16 %v1098_v26, %v1097_v25 }
 0x2c8   : > { %v1037_v32 = vadd.f32 %v1695_v27, %v2097_v58  ;;  %v1028_v33 = vpop.f32.mrb[25].mxu0  ;;  %v1109_v34 = vpack.c.bf16 %v1096_v29, %v1095_v28 }
 0x2c9   : > { %v1029_v35 = vadd.f32 %v2097_v58, %v1028_v33  ;;  %v1696_v36 = vpop.f32.mrb[26].mxu0 }
 0x2ca   : > { %v1085_v37 = vmul.f32 0.01, %v1037_v32  ;;  %v1040_v38 = vadd.f32 %v1696_v36, %v2097_v58  ;;  %v1031_v39 = vpop.f32.mrb[27].mxu0  ;;  %1721 = vmatprep.mubr.bf16.mxu1 %v1109_v34  ;;  %vm1069_vm8 = vcmp.gt.f32.partialorder %v1037_v32, 0.0 }
 0x2cb   : > { %v1083_v40 = vmul.f32 0.01, %v1029_v35  ;;  %v1032_v30 = vadd.f32 %v2097_v58, %v1031_v39  ;;  %1722 = vmatmul.mubr.bf16.gmra.mrb[20].mxu1 %v1110_v31  ;;  %vm1067_vm9 = vcmp.gt.f32.partialorder %v1029_v35, 0.0 }
 0x2cc   : > { %vm1070_vm10 = vcmp.gt.f32.partialorder %v1040_v38, 0.0  ;;  %v1086_v41 = vmul.f32 0.01, %v1040_v38  ;;  %v1101_v43 = vsel %vm1069_vm8, %v1037_v32, %v1085_v37 }
 0x2cd   : > { %vm1068_vm11 = vcmp.gt.f32.partialorder %v1032_v30, 0.0  ;;  %v1084_v42 = vmul.f32 0.01, %v1032_v30  ;;  %v1099_v46 = vsel %vm1067_vm9, %v1029_v35, %v1083_v40 }
 0x2ce   : > { %v1102_v44 = vsel %vm1070_vm10, %v1040_v38, %v1086_v41 }
 0x2cf   : > { %v1699_v45 = vpop.f32.mrb[28].mxu0  ;;  %v1100_v48 = vsel %vm1068_vm11, %v1032_v30, %v1084_v42  ;;  %v1112_v49 = vpack.c.bf16 %v1102_v44, %v1101_v43 }
 0x2d0   : > { %v1053_v50 = vadd.f32 %v1699_v45, %v2097_v58  ;;  %v1044_v51 = vpop.f32.mrb[29].mxu0  ;;  %v1111_v52 = vpack.c.bf16 %v1100_v48, %v1099_v46 }
 0x2d1   : > { %v1045_v53 = vadd.f32 %v2097_v58, %v1044_v51  ;;  %v1700_v54 = vpop.f32.mrb[30].mxu0 }
 0x2d2   : > { %v1089_v55 = vmul.f32 0.01, %v1053_v50  ;;  %v1056_v56 = vadd.f32 %v1700_v54, %v2097_v58  ;;  %v1047_v47 = vpop.f32.mrb[31].mxu0  ;;  %1725 = vmatprep.mubr.bf16.mxu1 %v1111_v52  ;;  %vm1073_vm12 = vcmp.gt.f32.partialorder %v1053_v50, 0.0 }
 0x2d3   : > { %v1087_v57 = vmul.f32 0.01, %v1045_v53  ;;  %v1048_v59 = vadd.f32 %v2097_v58, %v1047_v47  ;;  %1726 = vmatmul.mubr.bf16.gmra.mrb[24].mxu1 %v1112_v49  ;;  %vm1071_vm13 = vcmp.gt.f32.partialorder %v1045_v53, 0.0 }
 0x2d4   : > { %vm1074_vm14 = vcmp.gt.f32.partialorder %v1056_v56, 0.0  ;;  %v1090_v60 = vmul.f32 0.01, %v1056_v56  ;;  %v1105_v62 = vsel %vm1073_vm12, %v1053_v50, %v1089_v55 }
 0x2d5   : > { %vm1072_vm15 = vcmp.gt.f32.partialorder %v1048_v59, 0.0  ;;  %v1088_v61 = vmul.f32 0.01, %v1048_v59  ;;  %v1103_v0 = vsel %vm1071_vm13, %v1045_v53, %v1087_v57 }
 0x2d6   : > { %v1106_v63 = vsel %vm1074_vm14, %v1056_v56, %v1090_v60 }
 0x2d7   : > { %v1104_v1 = vsel %vm1072_vm15, %v1048_v59, %v1088_v61  ;;  %v1114_v2 = vpack.c.bf16 %v1106_v63, %v1105_v62 }
 0x2d8   : > { %v1113_v3 = vpack.c.bf16 %v1104_v1, %v1103_v0 }
 0x2da   : > { %1729 = vmatprep.mubr.bf16.mxu1 %v1113_v3 }
 0x2db   : > { %1730 = vmatmul.mubr.bf16.gmra.mrb[28].mxu1 %v1114_v2 }
 0x396   : > { %v1719_v58 = vpop.f32.mrb[16].mxu1 }
 0x397   : > { %v1228_v5 = vadd.f32 %v1719_v58, %v2118_v4  ;;  %v1219_v6 = vpop.f32.mrb[17].mxu1 }
 0x398   : > { %v1220_v7 = vadd.f32 %v2118_v4, %v1219_v6  ;;  %v1720_v8 = vpop.f32.mrb[18].mxu1 }
 0x399   : > { %v1284_v9 = vsub.f32 0.0, %v1228_v5  ;;  %v1231_v10 = vadd.f32 %v1720_v8, %v2118_v4  ;;  %v1222_v11 = vpop.f32.mrb[19].mxu1 }
 0x39a   : > { %v1282_v12 = vsub.f32 0.0, %v1220_v7  ;;  %v1223_v13 = vadd.f32 %v2118_v4, %v1222_v11 }
 0x39b   : > { %v1302_v14 = vmul.f32 1.442695, %v1284_v9  ;;  %v1285_v15 = vsub.f32 0.0, %v1231_v10 }
 0x39c   : > { %v1298_v16 = vmul.f32 1.442695, %v1282_v12  ;;  %v1283_v17 = vsub.f32 0.0, %v1223_v13 }
 0x39d   : > { %1781 = vpow2.f32 %v1302_v14  ;;  %v1304_v18 = vmul.f32 1.442695, %v1285_v15 }
 0x39e   : > { %1783 = vpow2.f32 %v1298_v16  ;;  %v1300_v19 = vmul.f32 1.442695, %v1283_v17  ;;  %v1723_v20 = vpop.f32.mrb[20].mxu1 }
 0x39f   : > { %1785 = vpow2.f32 %v1304_v18  ;;  %v1244_v21 = vadd.f32 %v1723_v20, %v2118_v4  ;;  %v1235_v22 = vpop.f32.mrb[21].mxu1 }
 0x3a0   : > { %1787 = vpow2.f32 %v1300_v19  ;;  %v1236_v23 = vadd.f32 %v2118_v4, %v1235_v22  ;;  %v1724_v24 = vpop.f32.mrb[22].mxu1 }
 0x3a1   : > { %v1288_v25 = vsub.f32 0.0, %v1244_v21  ;;  %v1247_v26 = vadd.f32 %v1724_v24, %v2118_v4  ;;  %v1238_v27 = vpop.f32.mrb[23].mxu1 }
 0x3a2   : > { %v1286_v28 = vsub.f32 0.0, %v1236_v23  ;;  %v1239_v29 = vadd.f32 %v2118_v4, %v1238_v27 }
 0x3a3   : > { %v1310_v31 = vmul.f32 1.442695, %v1288_v25  ;;  %v1289_v32 = vsub.f32 0.0, %v1247_v26 }
 0x3a4   : > { %v1306_v33 = vmul.f32 1.442695, %v1286_v28  ;;  %v1287_v34 = vsub.f32 0.0, %v1239_v29 }
 0x3a5   : > { %1789 = vpow2.f32 %v1310_v31  ;;  %v1312_v35 = vmul.f32 1.442695, %v1289_v32 }
 0x3a6   : > { %1791 = vpow2.f32 %v1306_v33  ;;  %v1308_v36 = vmul.f32 1.442695, %v1287_v34  ;;  %v1727_v37 = vpop.f32.mrb[24].mxu1 }
 0x3a7   : > { %v1782_v38 = vpop.eup %1781  ;;  %1793 = vpow2.f32 %v1312_v35  ;;  %v1260_v39 = vadd.f32 %v1727_v37, %v2118_v4  ;;  %v1251_v40 = vpop.f32.mrb[25].mxu1 }
 0x3a8   : > { %v1784_v30 = vpop.eup %1783  ;;  %v1332_v41 = vadd.f32 1.0, %v1782_v38  ;;  %1795 = vpow2.f32 %v1308_v36  ;;  %v1252_v42 = vadd.f32 %v2118_v4, %v1251_v40  ;;  %v1728_v43 = vpop.f32.mrb[26].mxu1 }
 0x3a9   : > { %v1786_v44 = vpop.eup %1785  ;;  %v1330_v45 = vadd.f32 1.0, %v1784_v30  ;;  %v1292_v46 = vsub.f32 0.0, %v1260_v39  ;;  %v1263_v48 = vadd.f32 %v1728_v43, %v2118_v4  ;;  %v1254_v49 = vpop.f32.mrb[27].mxu1 }
 0x3aa   : > { %v1788_v50 = vpop.eup %1787  ;;  %1797 = vrcp.f32 %v1332_v41  ;;  %v1333_v51 = vadd.f32 1.0, %v1786_v44  ;;  %v1290_v52 = vsub.f32 0.0, %v1252_v42  ;;  %v1255_v53 = vadd.f32 %v2118_v4, %v1254_v49 }
 0x3ab   : > { %1799 = vrcp.f32 %v1330_v45  ;;  %v1331_v54 = vadd.f32 1.0, %v1788_v50  ;;  %v1318_v55 = vmul.f32 1.442695, %v1292_v46  ;;  %v1293_v56 = vsub.f32 0.0, %v1263_v48 }
 0x3ac   : > { %1801 = vrcp.f32 %v1333_v51  ;;  %v1314_v47 = vmul.f32 1.442695, %v1290_v52  ;;  %v1291_v57 = vsub.f32 0.0, %v1255_v53 }
 0x3ad   : > { %1803 = vrcp.f32 %v1331_v54  ;;  %v1320_v59 = vmul.f32 1.442695, %v1293_v56 }
 0x3ae   : > { %1805 = vpow2.f32 %v1318_v55  ;;  %v1316_v60 = vmul.f32 1.442695, %v1291_v57  ;;  %v1731_v61 = vpop.f32.mrb[28].mxu1 }
 0x3af   : > { %v1790_v62 = vpop.eup %1789  ;;  %1807 = vpow2.f32 %v1314_v47  ;;  %v1276_v63 = vadd.f32 %v1731_v61, %v2118_v4  ;;  %v1267_v0 = vpop.f32.mrb[29].mxu1 }
 0x3b0   : > { %v1792_v1 = vpop.eup %1791  ;;  %v1336_v2 = vadd.f32 1.0, %v1790_v62  ;;  %1809 = vpow2.f32 %v1320_v59  ;;  %v1268_v3 = vadd.f32 %v2118_v4, %v1267_v0  ;;  %v1732_v58 = vpop.f32.mrb[30].mxu1 }
 0x3b1   : > { %v1794_v5 = vpop.eup %1793  ;;  %v1334_v6 = vadd.f32 1.0, %v1792_v1  ;;  %1811 = vpow2.f32 %v1316_v60  ;;  %v1296_v7 = vsub.f32 0.0, %v1276_v63  ;;  %v1279_v8 = vadd.f32 %v1732_v58, %v2118_v4  ;;  %v1270_v9 = vpop.f32.mrb[31].mxu1 }
 0x3b2   : > { %v1796_v10 = vpop.eup %1795  ;;  %1813 = vrcp.f32 %v1336_v2  ;;  %v1337_v11 = vadd.f32 1.0, %v1794_v5  ;;  %v1294_v12 = vsub.f32 0.0, %v1268_v3  ;;  %v1271_v13 = vadd.f32 %v2118_v4, %v1270_v9 }
 0x3b3   : > { %1815 = vrcp.f32 %v1334_v6  ;;  %v1335_v14 = vadd.f32 1.0, %v1796_v10  ;;  %v1326_v15 = vmul.f32 1.442695, %v1296_v7  ;;  %v1297_v16 = vsub.f32 0.0, %v1279_v8 }
 0x3b4   : > { %v1798_v17 = vpop.eup %1797  ;;  %1817 = vrcp.f32 %v1337_v11  ;;  %v1322_v18 = vmul.f32 1.442695, %v1294_v12  ;;  %v1295_v19 = vsub.f32 0.0, %v1271_v13 }
 0x3b5   : > { %v1800_v20 = vpop.eup %1799  ;;  %1380 = vst [vmem:[%s2140_s27 + $0x10] sm:$0xff] %v1798_v17  ;;  %1819 = vrcp.f32 %v1335_v14  ;;  %v1328_v21 = vmul.f32 1.442695, %v1297_v16 }
 0x3b6   : > { %v1802_v22 = vpop.eup %1801  ;;  %1378 = vst [vmem:[%s2140_s27] sm:$0xff] %v1800_v20  ;;  %1821 = vpow2.f32 %v1326_v15  ;;  %v1324_v23 = vmul.f32 1.442695, %v1295_v19 }
 0x3b7   : > { %v1804_v24 = vpop.eup %1803  ;;  %1381 = vst [vmem:[%s2140_s27 + $0x18] sm:$0xff] %v1802_v22  ;;  %1823 = vpow2.f32 %v1322_v18 }
 0x3b8   : > { %v1806_v4 = vpop.eup %1805  ;;  %1379 = vst [vmem:[%s2140_s27 + $0x8] sm:$0xff] %v1804_v24  ;;  %1825 = vpow2.f32 %v1328_v21 }
 0x3b9   : > { %v1808_v25 = vpop.eup %1807  ;;  %v1340_v26 = vadd.f32 1.0, %v1806_v4  ;;  %1827 = vpow2.f32 %v1324_v23 }
 0x3ba   : > { %v1810_v27 = vpop.eup %1809  ;;  %v1338_v28 = vadd.f32 1.0, %v1808_v25 }
 0x3bb   : > { %v1812_v29 = vpop.eup %1811  ;;  %1829 = vrcp.f32 %v1340_v26  ;;  %v1341_v31 = vadd.f32 1.0, %v1810_v27 }
 0x3bc   : > { %v1814_v32 = vpop.eup %1813  ;;  %1831 = vrcp.f32 %v1338_v28  ;;  %v1339_v33 = vadd.f32 1.0, %v1812_v29 }
 0x3bd   : > { %v1816_v34 = vpop.eup %1815  ;;  %1384 = vst [vmem:[%s2140_s27 + $0x30] sm:$0xff] %v1814_v32  ;;  %1833 = vrcp.f32 %v1341_v31 }
 0x3be   : > { %v1818_v35 = vpop.eup %1817  ;;  %1382 = vst [vmem:[%s2140_s27 + $0x20] sm:$0xff] %v1816_v34  ;;  %1835 = vrcp.f32 %v1339_v33 }
 0x3bf   : > { %v1820_v36 = vpop.eup %1819  ;;  %1385 = vst [vmem:[%s2140_s27 + $0x38] sm:$0xff] %v1818_v35 }
 0x3c0   : > { %v1822_v37 = vpop.eup %1821  ;;  %1383 = vst [vmem:[%s2140_s27 + $0x28] sm:$0xff] %v1820_v36 }
 0x3c1   : > { %v1824_v38 = vpop.eup %1823  ;;  %v1344_v39 = vadd.f32 1.0, %v1822_v37 }
 0x3c2   : > { %v1826_v40 = vpop.eup %1825  ;;  %v1342_v30 = vadd.f32 1.0, %v1824_v38 }
 0x3c3   : > { %v1828_v41 = vpop.eup %1827  ;;  %1837 = vrcp.f32 %v1344_v39  ;;  %v1345_v42 = vadd.f32 1.0, %v1826_v40 }
 0x3c4   : > { %1839 = vrcp.f32 %v1342_v30  ;;  %v1343_v43 = vadd.f32 1.0, %v1828_v41 }
 0x3c5   : > { %v1830_v44 = vpop.eup %1829  ;;  %1841 = vrcp.f32 %v1345_v42 }
 0x3c6   : > { %v1832_v45 = vpop.eup %1831  ;;  %1388 = vst [vmem:[%s2140_s27 + $0x50] sm:$0xff] %v1830_v44  ;;  %1843 = vrcp.f32 %v1343_v43 }
 0x3c7   : > { %v1834_v46 = vpop.eup %1833  ;;  %1386 = vst [vmem:[%s2140_s27 + $0x40] sm:$0xff] %v1832_v45 }
 0x3c8   : > { %v1836_v48 = vpop.eup %1835  ;;  %1389 = vst [vmem:[%s2140_s27 + $0x58] sm:$0xff] %v1834_v46 }
 0x3c9   : > { %1387 = vst [vmem:[%s2140_s27 + $0x48] sm:$0xff] %v1836_v48 }
 0x3cd   : > { %v1838_v49 = vpop.eup %1837 }
 0x3ce   : > { %v1840_v50 = vpop.eup %1839  ;;  %1392 = vst [vmem:[%s2140_s27 + $0x70] sm:$0xff] %v1838_v49 }
 0x3cf   : > { %v1842_v51 = vpop.eup %1841  ;;  %1390 = vst [vmem:[%s2140_s27 + $0x60] sm:$0xff] %v1840_v50 }
 0x3d0   : > { %v1844_v52 = vpop.eup %1843  ;;  %1393 = vst [vmem:[%s2140_s27 + $0x78] sm:$0xff] %v1842_v51 }
 0x3d1   : > { %1391 = vst [vmem:[%s2140_s27 + $0x68] sm:$0xff] %v1844_v52 }
 0x3d2 PF: > { %s21_s13 = sadd.s32 1, %s1851_s13  }
 0x3d3   : > { %p18_p4 = scmp.ge.s32.totalorder %s21_s13, 4  }
 0x3d5   :  { %20 = sbr.rel (!%p18_p4) target bundleno = 1 (0x1), region = 98 }

</bundles_post_ra>
